<compile_context>
chip_gen: v7x
topology: tpu7x:2x2x1
jax: 0.10.0
libtpu: 0.0.40
codegen_flags: <defaults>
</compile_context>

<pallas_src>
import functools

import jax
import jax.numpy as jnp
from jax.experimental import pallas as pl
from jax.experimental.pallas import tpu as pltpu


def _round_up(v, m):
    return ((v + m - 1) // m) * m


def _pad2(a, rows, cols):
    r, c = a.shape
    return jnp.pad(a, ((0, rows - r), (0, cols - c)))


def _ae_kernel(
    x_ref,                    # (tm, NFP)
    w1_ref, b1_ref,           # (NFP, 256), (1, 256)
    w2_ref, b2_ref,           # (256, 128), (1, 128)
    w3c_ref, b3c_ref,         # (128, KP+128), (1, KP+128)  [enc | folded dec layer 1]
    w5_ref, b5_ref,           # (128, 256), (1, 256)
    w6_ref, b6_ref,           # (256, NP), (1, NP)
    enc_ref, dec_ref,
    *, kp,
):
    cd = w1_ref.dtype  # MXU input dtype (f32 or bf16); accumulation is always f32.

    # ---- encoder: Linear -> ReLU -> Linear -> ReLU ----
    h = jnp.dot(x_ref[...], w1_ref[...], preferred_element_type=jnp.float32) + b1_ref[...]
    h = jnp.maximum(h, 0.0).astype(cd)
    h = jnp.dot(h, w2_ref[...], preferred_element_type=jnp.float32) + b2_ref[...]
    h2 = jnp.maximum(h, 0.0).astype(cd)

    # ---- single 256-wide MXU pass: [enc | pre-ReLU of first decoder layer] ----
    # relu(enc @ W4 + b4) == relu(h2 @ (W3 @ W4) + (b3 @ W4 + b4)) since there is
    # no nonlinearity between the bottleneck and the first decoder layer.
    z = jnp.dot(h2, w3c_ref[...], preferred_element_type=jnp.float32) + b3c_ref[...]
    enc_ref[...] = z[:, :kp].astype(enc_ref.dtype)      # kp is a 128 multiple: free slice

    # ---- decoder ----
    h = jnp.maximum(z[:, kp:], 0.0).astype(cd)
    h = jnp.dot(h, w5_ref[...], preferred_element_type=jnp.float32) + b5_ref[...]
    h = jnp.maximum(h, 0.0).astype(cd)
    dec = jnp.dot(h, w6_ref[...], preferred_element_type=jnp.float32) + b6_ref[...]
    dec_ref[...] = dec.astype(dec_ref.dtype)


@functools.partial(jax.jit, static_argnames=("tm", "compute_dtype", "return_padded"))
def ae_forward(x, params, *, tm=1024, compute_dtype=None, return_padded=False):
    """Runs the AE forward pass. Returns (encoded, decoded).

    compute_dtype selects the MXU input dtype (default: x.dtype; pass
    jnp.bfloat16 for the fast MXU path on all TPU generations). Matmuls
    accumulate in f32 and biases are added in f32; outputs keep x.dtype.
    With return_padded=True the lane-padded outputs are returned directly
    (padded columns are exactly zero), avoiding an extra HBM slice copy.
    """
    B, n_features = x.shape
    k = params["w3"].shape[1]
    out_dtype = x.dtype
    cd = jnp.dtype(compute_dtype) if compute_dtype is not None else jnp.dtype(x.dtype)

    H2 = 128                           # hidden width 100 padded to one lane tile
    NFP = _round_up(n_features, 128)   # padded feature width (x lanes, W1 rows, dec lanes)
    KP = _round_up(max(k, 1), 128)     # padded latent width
    NP = NFP

    f32 = lambda a: a.astype(jnp.float32)

    # Fold encoder bottleneck into the first decoder layer (tiny one-off matmul).
    w34 = f32(params["w3"]) @ f32(params["w4"])                       # (100, 100)
    b34 = f32(params["b3"]) @ f32(params["w4"]) + f32(params["b4"])   # (1, 100)

    # Lane-dense, zero-padded parameter set. Weights carry the compute dtype;
    # biases stay f32 (added after the f32-accumulated dot).
    x_p = _pad2(x, B, NFP).astype(cd)
    W1 = _pad2(params["w1"], NFP, 256).astype(cd)
    W2 = _pad2(params["w2"], 256, H2).astype(cd)
    W3c = jnp.concatenate(
        [_pad2(f32(params["w3"]), H2, KP), _pad2(w34, H2, H2)], axis=1).astype(cd)
    W5 = _pad2(params["w5"], H2, 256).astype(cd)
    W6 = _pad2(params["w6"], 256, NP).astype(cd)
    B1 = f32(params["b1"])
    B2 = _pad2(f32(params["b2"]), 1, H2)
    B3c = jnp.concatenate([_pad2(f32(params["b3"]), 1, KP), _pad2(b34, 1, H2)], axis=1)
    B5 = f32(params["b5"])
    B6 = _pad2(f32(params["b6"]), 1, NP)

    weight_args = (W1, B1, W2, B2, W3c, B3c, W5, B5, W6, B6)

    # --- batch-tile selection ---
    tile_mult = 16 if jnp.dtype(cd) == jnp.bfloat16 else 8
    tm_eff = _round_up(max(min(tm, B), 1), tile_mult)
    # Force >=2 grid steps when B allows it so the "parallel" axis can shard
    # across both TensorCores on v7x (negligible cost on single-TC v5e/v6e).
    if B >= 2 * tile_mult:
        tm_eff = min(tm_eff, _round_up((B + 1) // 2, tile_mult))

    cs = jnp.dtype(cd).itemsize
    osz = jnp.dtype(out_dtype).itemsize
    w_bytes = cs * (NFP * 256 + 256 * H2 + H2 * (KP + H2) + H2 * 256 + 256 * NP)
    b_bytes = 4 * (256 + H2 + (KP + H2) + 256 + NP)

    def _budget(t):
        io = 2 * t * NFP * cs + 2 * t * (KP + NP) * osz        # double-buffered x / enc / dec
        inter = 4 * t * (256 + H2 + (KP + H2) + 256 + NP)      # f32 intermediates (rough)
        return io + inter + w_bytes + b_bytes                   # weights single-buffered

    # Keep the working set under ~36 MiB so input/output double-buffering stays
    # alive even on v7x's 64 MiB VMEM (and under v5e's physical budget).
    while tm_eff > tile_mult and _budget(tm_eff) > (36 << 20):
        tm_eff = max(_round_up(tm_eff // 2, tile_mult), tile_mult)

    vmem_limit = int(min(max(int(_budget(tm_eff) * 1.5) + (8 << 20), 32 << 20), 64 << 20))

    grid = (pl.cdiv(B, tm_eff),)

    def batch_spec(width):
        return pl.BlockSpec((tm_eff, width), lambda i: (i, 0))

    def const_spec(shape):
        # Constant block index + single buffer: weights stay resident in VMEM,
        # no wasted second pipeline buffer.
        return pl.BlockSpec(shape, lambda i: (0, 0), pipeline_mode=pl.Buffered(1))

    weight_specs = [const_spec(w.shape) for w in weight_args]

    enc_p, dec_p = pl.pallas_call(
        functools.partial(_ae_kernel, kp=KP),
        out_shape=(
            jax.ShapeDtypeStruct((B, KP), out_dtype),
            jax.ShapeDtypeStruct((B, NP), out_dtype),
        ),
        grid_spec=pltpu.PrefetchScalarGridSpec(
            num_scalar_prefetch=0,
            grid=grid,
            in_specs=[batch_spec(NFP)] + weight_specs,
            out_specs=[batch_spec(KP), batch_spec(NP)],
        ),
        compiler_params=pltpu.CompilerParams(
            dimension_semantics=("parallel",),
            vmem_limit_bytes=vmem_limit,
        ),
    )(x_p, *weight_args)

    if return_padded:
        # Padded columns are exactly zero; caller slices lazily (no HBM copy here).
        return enc_p, dec_p
    return enc_p[:, :k], dec_p[:, :n_features]


def init_params(key, k, n_features, dtype=jnp.float32):
    """Deterministic PyTorch-style (uniform +-1/sqrt(fan_in)) initialization.

    Weights are stored [in_dim, out_dim] (i.e. already transposed)."""
    dims = [
        (n_features, 256), (256, 100), (100, k),      # encoder
        (k, 100), (100, 256), (256, n_features),      # decoder
    ]
    params = {}
    for idx, (fan_in, fan_out) in enumerate(dims, start=1):
        key, kw, kb = jax.random.split(key, 3)
        bound = 1.0 / jnp.sqrt(fan_in)
        params[f"w{idx}"] = jax.random.uniform(
            kw, (fan_in, fan_out), dtype, minval=-bound, maxval=bound)
        params[f"b{idx}"] = jax.random.uniform(
            kb, (1, fan_out), dtype, minval=-bound, maxval=bound)
    return params


def ae_reference(x, params):
    """Plain-JAX reference for correctness checking (unfolded, unpadded)."""
    h = jnp.maximum(x @ params["w1"] + params["b1"], 0.0)
    h = jnp.maximum(h @ params["w2"] + params["b2"], 0.0)
    enc = h @ params["w3"] + params["b3"]
    h = jnp.maximum(enc @ params["w4"] + params["b4"], 0.0)
    h = jnp.maximum(h @ params["w5"] + params["b5"], 0.0)
    dec = h @ params["w6"] + params["b6"]
    return enc, dec


if __name__ == "__main__":
    key = jax.random.PRNGKey(0)
    k_latent = 8
    n_features = 32
    batch = 64

    kparams, kx = jax.random.split(key)
    params = init_params(kparams, k_latent, n_features)
    x = jax.random.normal(kx, (batch, n_features), jnp.float32)

    enc_ref, dec_ref = ae_reference(x, params)

    # 1) f32 path, default tile (auto-splits into 2 grid steps of 32 rows).
    enc, dec = jax.block_until_ready(ae_forward(x, params))
    assert enc.shape == (batch, k_latent)
    assert dec.shape == (batch, n_features)
    assert jnp.allclose(enc, enc_ref, atol=1e-4, rtol=1e-4)
    assert jnp.allclose(dec, dec_ref, atol=1e-4, rtol=1e-4)

    # 2) f32, ragged multi-step grid with a partial last tile (64 = 24 + 24 + 16).
    enc2, dec2 = jax.block_until_ready(ae_forward(x, params, tm=24))
    assert jnp.allclose(enc2, enc_ref, atol=1e-4, rtol=1e-4)
    assert jnp.allclose(dec2, dec_ref, atol=1e-4, rtol=1e-4)

    # 3) bf16 fast path: bf16 activations/weights into the MXU, f32 accumulation.
    #    Note: the W3@W4 fold is computed in f32 then cast, so rounding order
    #    differs slightly from the unfolded reference (covered by the tolerance).
    enc3, dec3 = jax.block_until_ready(ae_forward(x.astype(jnp.bfloat16), params))
    assert enc3.dtype == jnp.bfloat16
    assert jnp.allclose(enc3.astype(jnp.float32), enc_ref, atol=1e-1, rtol=1e-1)
    assert jnp.allclose(dec3.astype(jnp.float32), dec_ref, atol=1e-1, rtol=1e-1)

    # 4) bf16 compute with f32 I/O (keeps f32 latents downstream) and padded,
    #    lane-dense outputs with no post-kernel slice copy.
    enc4, dec4 = jax.block_until_ready(
        ae_forward(x, params, compute_dtype=jnp.bfloat16, return_padded=True))
    assert enc4.shape == (batch, 128) and enc4.dtype == jnp.float32
    assert jnp.allclose(enc4[:, :k_latent], enc_ref, atol=1e-1, rtol=1e-1)
    assert jnp.allclose(dec4[:, :n_features], dec_ref, atol=1e-1, rtol=1e-1)
    assert jnp.all(enc4[:, k_latent:] == 0.0)
    assert jnp.all(dec4[:, n_features:] == 0.0)

    print("KERNEL_OK")
</pallas_src>

<mosaic_0001>
module attributes {stable_mosaic.version = 11 : i64} {
  func.func @_ae_kernel(%arg0: i32, %arg1: memref<32x128xf32, #tpu.memory_space<vmem>>, %arg2: memref<128x256xf32, #tpu.memory_space<vmem>>, %arg3: memref<1x256xf32, #tpu.memory_space<vmem>>, %arg4: memref<256x128xf32, #tpu.memory_space<vmem>>, %arg5: memref<1x128xf32, #tpu.memory_space<vmem>>, %arg6: memref<128x256xf32, #tpu.memory_space<vmem>>, %arg7: memref<1x256xf32, #tpu.memory_space<vmem>>, %arg8: memref<128x256xf32, #tpu.memory_space<vmem>>, %arg9: memref<1x256xf32, #tpu.memory_space<vmem>>, %arg10: memref<256x128xf32, #tpu.memory_space<vmem>>, %arg11: memref<1x128xf32, #tpu.memory_space<vmem>>, %arg12: memref<32x128xf32, #tpu.memory_space<vmem>>, %arg13: memref<32x128xf32, #tpu.memory_space<vmem>>) attributes {dimension_semantics = [#tpu.dimension_semantics<parallel>], iteration_bounds = array<i64: 2>, scalar_prefetch = 0 : i64, scratch_operands = 0 : i64, tpu.core_type = #tpu.core_type<tc>, window_params = [{transform_indices = @transform_0, window_bounds = array<i64: 32, 128>}, {pipeline_mode = #tpu.pipeline_mode<synchronous>, transform_indices = @transform_1, window_bounds = array<i64: 128, 256>}, {pipeline_mode = #tpu.pipeline_mode<synchronous>, transform_indices = @transform_2, window_bounds = array<i64: 1, 256>}, {pipeline_mode = #tpu.pipeline_mode<synchronous>, transform_indices = @transform_3, window_bounds = array<i64: 256, 128>}, {pipeline_mode = #tpu.pipeline_mode<synchronous>, transform_indices = @transform_4, window_bounds = array<i64: 1, 128>}, {pipeline_mode = #tpu.pipeline_mode<synchronous>, transform_indices = @transform_5, window_bounds = array<i64: 128, 256>}, {pipeline_mode = #tpu.pipeline_mode<synchronous>, transform_indices = @transform_6, window_bounds = array<i64: 1, 256>}, {pipeline_mode = #tpu.pipeline_mode<synchronous>, transform_indices = @transform_7, window_bounds = array<i64: 128, 256>}, {pipeline_mode = #tpu.pipeline_mode<synchronous>, transform_indices = @transform_8, window_bounds = array<i64: 1, 256>}, {pipeline_mode = #tpu.pipeline_mode<synchronous>, transform_indices = @transform_9, window_bounds = array<i64: 256, 128>}, {pipeline_mode = #tpu.pipeline_mode<synchronous>, transform_indices = @transform_10, window_bounds = array<i64: 1, 128>}, {transform_indices = @transform_11, window_bounds = array<i64: 32, 128>}, {transform_indices = @transform_12, window_bounds = array<i64: 32, 128>}]} {
    %c0 = arith.constant 0 : index
    %c0_0 = arith.constant 0 : index
    %0 = vector.load %arg1[%c0, %c0_0] : memref<32x128xf32, #tpu.memory_space<vmem>>, vector<32x128xf32>
    %c0_1 = arith.constant 0 : index
    %c0_2 = arith.constant 0 : index
    %1 = vector.load %arg2[%c0_1, %c0_2] : memref<128x256xf32, #tpu.memory_space<vmem>>, vector<128x256xf32>
    %cst = arith.constant dense<0.000000e+00> : vector<32x256xf32>
    %2 = tpu.matmul %0, %1, %cst {dimension_numbers = #tpu.dot_dimension_numbers<[1], [0], [0], [1], [0, 0, 1, 1], [], []>} : vector<32x128xf32>, vector<128x256xf32>, vector<32x256xf32> -> vector<32x256xf32>
    %c0_3 = arith.constant 0 : index
    %c0_4 = arith.constant 0 : index
    %3 = vector.load %arg3[%c0_3, %c0_4] : memref<1x256xf32, #tpu.memory_space<vmem>>, vector<1x256xf32>
    %4 = vector.broadcast %3 : vector<1x256xf32> to vector<32x256xf32>
    %5 = arith.addf %2, %4 : vector<32x256xf32>
    %cst_5 = arith.constant 0.000000e+00 : f32
    %6 = vector.broadcast %cst_5 : f32 to vector<32x256xf32>
    %7 = arith.maximumf %5, %6 : vector<32x256xf32>
    %c0_6 = arith.constant 0 : index
    %c0_7 = arith.constant 0 : index
    %8 = vector.load %arg4[%c0_6, %c0_7] : memref<256x128xf32, #tpu.memory_space<vmem>>, vector<256x128xf32>
    %cst_8 = arith.constant dense<0.000000e+00> : vector<32x128xf32>
    %9 = tpu.matmul %7, %8, %cst_8 {dimension_numbers = #tpu.dot_dimension_numbers<[1], [0], [0], [1], [0, 0, 1, 1], [], []>} : vector<32x256xf32>, vector<256x128xf32>, vector<32x128xf32> -> vector<32x128xf32>
    %c0_9 = arith.constant 0 : index
    %c0_10 = arith.constant 0 : index
    %10 = vector.load %arg5[%c0_9, %c0_10] : memref<1x128xf32, #tpu.memory_space<vmem>>, vector<1x128xf32>
    %11 = vector.broadcast %10 : vector<1x128xf32> to vector<32x128xf32>
    %12 = arith.addf %9, %11 : vector<32x128xf32>
    %cst_11 = arith.constant 0.000000e+00 : f32
    %13 = vector.broadcast %cst_11 : f32 to vector<32x128xf32>
    %14 = arith.maximumf %12, %13 : vector<32x128xf32>
    %c0_12 = arith.constant 0 : index
    %c0_13 = arith.constant 0 : index
    %15 = vector.load %arg6[%c0_12, %c0_13] : memref<128x256xf32, #tpu.memory_space<vmem>>, vector<128x256xf32>
    %cst_14 = arith.constant dense<0.000000e+00> : vector<32x256xf32>
    %16 = tpu.matmul %14, %15, %cst_14 {dimension_numbers = #tpu.dot_dimension_numbers<[1], [0], [0], [1], [0, 0, 1, 1], [], []>} : vector<32x128xf32>, vector<128x256xf32>, vector<32x256xf32> -> vector<32x256xf32>
    %c0_15 = arith.constant 0 : index
    %c0_16 = arith.constant 0 : index
    %17 = vector.load %arg7[%c0_15, %c0_16] : memref<1x256xf32, #tpu.memory_space<vmem>>, vector<1x256xf32>
    %18 = vector.broadcast %17 : vector<1x256xf32> to vector<32x256xf32>
    %19 = arith.addf %16, %18 : vector<32x256xf32>
    %20 = vector.extract_strided_slice %19 {offsets = [0, 0], sizes = [32, 128], strides = [1, 1]} : vector<32x256xf32> to vector<32x128xf32>
    %c0_17 = arith.constant 0 : index
    %c0_18 = arith.constant 0 : index
    %21 = vector.load %arg12[%c0_17, %c0_18] : memref<32x128xf32, #tpu.memory_space<vmem>>, vector<32x128xf32>
    tpu.vector_store %arg12[%c0_17, %c0_18], %20 {strides = array<i32>} : memref<32x128xf32, #tpu.memory_space<vmem>>, vector<32x128xf32>,
    %22 = vector.extract_strided_slice %19 {offsets = [0, 128], sizes = [32, 128], strides = [1, 1]} : vector<32x256xf32> to vector<32x128xf32>
    %cst_19 = arith.constant 0.000000e+00 : f32
    %23 = vector.broadcast %cst_19 : f32 to vector<32x128xf32>
    %24 = arith.maximumf %22, %23 : vector<32x128xf32>
    %c0_20 = arith.constant 0 : index
    %c0_21 = arith.constant 0 : index
    %25 = vector.load %arg8[%c0_20, %c0_21] : memref<128x256xf32, #tpu.memory_space<vmem>>, vector<128x256xf32>
    %cst_22 = arith.constant dense<0.000000e+00> : vector<32x256xf32>
    %26 = tpu.matmul %24, %25, %cst_22 {dimension_numbers = #tpu.dot_dimension_numbers<[1], [0], [0], [1], [0, 0, 1, 1], [], []>} : vector<32x128xf32>, vector<128x256xf32>, vector<32x256xf32> -> vector<32x256xf32>
    %c0_23 = arith.constant 0 : index
    %c0_24 = arith.constant 0 : index
    %27 = vector.load %arg9[%c0_23, %c0_24] : memref<1x256xf32, #tpu.memory_space<vmem>>, vector<1x256xf32>
    %28 = vector.broadcast %27 : vector<1x256xf32> to vector<32x256xf32>
    %29 = arith.addf %26, %28 : vector<32x256xf32>
    %cst_25 = arith.constant 0.000000e+00 : f32
    %30 = vector.broadcast %cst_25 : f32 to vector<32x256xf32>
    %31 = arith.maximumf %29, %30 : vector<32x256xf32>
    %c0_26 = arith.constant 0 : index
    %c0_27 = arith.constant 0 : index
    %32 = vector.load %arg10[%c0_26, %c0_27] : memref<256x128xf32, #tpu.memory_space<vmem>>, vector<256x128xf32>
    %cst_28 = arith.constant dense<0.000000e+00> : vector<32x128xf32>
    %33 = tpu.matmul %31, %32, %cst_28 {dimension_numbers = #tpu.dot_dimension_numbers<[1], [0], [0], [1], [0, 0, 1, 1], [], []>} : vector<32x256xf32>, vector<256x128xf32>, vector<32x128xf32> -> vector<32x128xf32>
    %c0_29 = arith.constant 0 : index
    %c0_30 = arith.constant 0 : index
    %34 = vector.load %arg11[%c0_29, %c0_30] : memref<1x128xf32, #tpu.memory_space<vmem>>, vector<1x128xf32>
    %35 = vector.broadcast %34 : vector<1x128xf32> to vector<32x128xf32>
    %36 = arith.addf %33, %35 : vector<32x128xf32>
    %c0_31 = arith.constant 0 : index
    %c0_32 = arith.constant 0 : index
    %37 = vector.load %arg13[%c0_31, %c0_32] : memref<32x128xf32, #tpu.memory_space<vmem>>, vector<32x128xf32>
    tpu.vector_store %arg13[%c0_31, %c0_32], %36 {strides = array<i32>} : memref<32x128xf32, #tpu.memory_space<vmem>>, vector<32x128xf32>,
    return
  }
  func.func @transform_0(%arg0: i32) -> (i32, i32) {
    %c0_i32 = arith.constant 0 : i32
    %c0_i32_0 = arith.constant 0 : i32
    return %arg0, %c0_i32 : i32, i32
  }
  func.func @transform_1(%arg0: i32) -> (i32, i32) {
    %c0_i32 = arith.constant 0 : i32
    %c0_i32_0 = arith.constant 0 : i32
    %c0_i32_1 = arith.constant 0 : i32
    return %c0_i32, %c0_i32_0 : i32, i32
  }
  func.func @transform_2(%arg0: i32) -> (i32, i32) {
    %c0_i32 = arith.constant 0 : i32
    %c0_i32_0 = arith.constant 0 : i32
    %c0_i32_1 = arith.constant 0 : i32
    return %c0_i32, %c0_i32_0 : i32, i32
  }
  func.func @transform_3(%arg0: i32) -> (i32, i32) {
    %c0_i32 = arith.constant 0 : i32
    %c0_i32_0 = arith.constant 0 : i32
    %c0_i32_1 = arith.constant 0 : i32
    return %c0_i32, %c0_i32_0 : i32, i32
  }
  func.func @transform_4(%arg0: i32) -> (i32, i32) {
    %c0_i32 = arith.constant 0 : i32
    %c0_i32_0 = arith.constant 0 : i32
    %c0_i32_1 = arith.constant 0 : i32
    return %c0_i32, %c0_i32_0 : i32, i32
  }
  func.func @transform_5(%arg0: i32) -> (i32, i32) {
    %c0_i32 = arith.constant 0 : i32
    %c0_i32_0 = arith.constant 0 : i32
    %c0_i32_1 = arith.constant 0 : i32
    return %c0_i32, %c0_i32_0 : i32, i32
  }
  func.func @transform_6(%arg0: i32) -> (i32, i32) {
    %c0_i32 = arith.constant 0 : i32
    %c0_i32_0 = arith.constant 0 : i32
    %c0_i32_1 = arith.constant 0 : i32
    return %c0_i32, %c0_i32_0 : i32, i32
  }
  func.func @transform_7(%arg0: i32) -> (i32, i32) {
    %c0_i32 = arith.constant 0 : i32
    %c0_i32_0 = arith.constant 0 : i32
    %c0_i32_1 = arith.constant 0 : i32
    return %c0_i32, %c0_i32_0 : i32, i32
  }
  func.func @transform_8(%arg0: i32) -> (i32, i32) {
    %c0_i32 = arith.constant 0 : i32
    %c0_i32_0 = arith.constant 0 : i32
    %c0_i32_1 = arith.constant 0 : i32
    return %c0_i32, %c0_i32_0 : i32, i32
  }
  func.func @transform_9(%arg0: i32) -> (i32, i32) {
    %c0_i32 = arith.constant 0 : i32
    %c0_i32_0 = arith.constant 0 : i32
    %c0_i32_1 = arith.constant 0 : i32
    return %c0_i32, %c0_i32_0 : i32, i32
  }
  func.func @transform_10(%arg0: i32) -> (i32, i32) {
    %c0_i32 = arith.constant 0 : i32
    %c0_i32_0 = arith.constant 0 : i32
    %c0_i32_1 = arith.constant 0 : i32
    return %c0_i32, %c0_i32_0 : i32, i32
  }
  func.func @transform_11(%arg0: i32) -> (i32, i32) {
    %c0_i32 = arith.constant 0 : i32
    %c0_i32_0 = arith.constant 0 : i32
    return %arg0, %c0_i32 : i32, i32
  }
  func.func @transform_12(%arg0: i32) -> (i32, i32) {
    %c0_i32 = arith.constant 0 : i32
    %c0_i32_0 = arith.constant 0 : i32
    return %arg0, %c0_i32 : i32, i32
  }
}

</mosaic_0001>

<bundles_post_ra>
// kernel: ae_forward.1
= control target key start
LH: loop header
LB: loop body
LE: loop exit
PB: predicated region body
PF: predicated region fallthrough
CT: control target
= control target key end

     0   :  { %s1566_s21 = smov 0   ;;  %s2142_s0 = inlined_call_operand.vmem [shape: f32[64,128], index: 0, kind: input, shape index: {}]   ;;  %s2143_s1 = inlined_call_operand.vmem [shape: f32[128,256], index: 1, kind: input, shape index: {}]   ;;  %s2144_s2 = inlined_call_operand.vmem [shape: f32[1,256], index: 2, kind: input, shape index: {}]   ;;  %s2145_s3 = inlined_call_operand.vmem [shape: f32[256,128], index: 3, kind: input, shape index: {}]   ;;  %s2146_s4 = inlined_call_operand.vmem [shape: f32[1,128], index: 4, kind: input, shape index: {}]   ;;  %s2147_s5 = inlined_call_operand.vmem [shape: f32[128,256], index: 5, kind: input, shape index: {}]   ;;  %s2148_s6 = inlined_call_operand.vmem [shape: f32[1,256], index: 6, kind: input, shape index: {}]   ;;  %s2149_s7 = inlined_call_operand.vmem [shape: f32[128,256], index: 7, kind: input, shape index: {}]   ;;  %s2150_s8 = inlined_call_operand.vmem [shape: f32[1,256], index: 8, kind: input, shape index: {}]   ;;  %s2151_s9 = inlined_call_operand.vmem [shape: f32[256,128], index: 9, kind: input, shape index: {}]   ;;  %s2152_s10 = inlined_call_operand.vmem [shape: f32[1,128], index: 10, kind: input, shape index: {}]   ;;  %s2153_s11 = inlined_call_operand.vmem [shape: f32[64,128], index: 11, kind: output, shape index: {0}]   ;;  %s2154_s12 = inlined_call_operand.vmem [shape: f32[64,128], index: 12, kind: output, shape index: {1}]  }
   0x1 LB: > { %s1204_s22 = sadd.s32 4294967295, %s1498_s21   ;;  %p1208_p0 = scmp.ge.s32.totalorder %s1498_s21, 1  ;;  %s1498_s21 = sphi %s1566_s21, %s23_s21  }
   0x2   : > { %p366_p1 = scmp.lt.s32.totalorder %s1498_s21, 3 }
   0x4   : > { %p367_p2 = pnand %p1208_p0, %p366_p1 }
   0x5   : > { %v436_v0 = vld [vmem:[%s2143_s1 + $0x8] sm:$0xff] (!%p367_p2)  ;;  %v438_v1 = vld [vmem:[%s2143_s1 + $0x18] sm:$0xff] (!%p367_p2)  ;;  %v435_v2 = vld [vmem:[%s2143_s1] sm:$0xff] (!%p367_p2)  ;;  %v1500_v7 = vmov (!%p367_p2), 0.0   ;;  %s1670_s19 = sshll.u32 (!%p367_p2), %s1204_s22, 2 }
   0x6   : > { %370 = sbr.rel (%p367_p2) target bundleno = 1142 (0x476), region = 64  ;;  %v1307_v3 = vpack.c.bf16 (!%p367_p2), %v438_v1, %v436_v0  ;;  %v437_v4 = vld [vmem:[%s2143_s1 + $0x10] sm:$0xff] (!%p367_p2)  ;;  %v440_v5 = vld [vmem:[%s2143_s1 + $0x28] sm:$0xff] (!%p367_p2)  ;;  %v442_v6 = vld [vmem:[%s2143_s1 + $0x38] sm:$0xff] (!%p367_p2)  ;;  %543 = vmatprep.mubr.f32.mxu0 (!%p367_p2), %v1500_v7  ;;  %p414_p3 = scmp.lt.s32.totalorder (!%p367_p2), %s1670_s19, 7 }
   0x7   : > { %v1309_v8 = vpack.c.bf16 (!%p367_p2), %v437_v4, %v435_v2  ;;  %v1311_v9 = vpack.c.bf16 (!%p367_p2), %v442_v6, %v440_v5  ;;  %v439_v10 = vld [vmem:[%s2143_s1 + $0x20] sm:$0xff] (!%p367_p2)  ;;  %v441_v11 = vld [vmem:[%s2143_s1 + $0x30] sm:$0xff] (!%p367_p2)  ;;  %v444_v12 = vld [vmem:[%s2143_s1 + $0x48] sm:$0xff] (!%p367_p2) }
   0x8   : > { %1308 = vmatprep.subr.bf16.mxu0 (!%p367_p2), %v1307_v3  ;;  %v446_v13 = vld [vmem:[%s2143_s1 + $0x58] sm:$0xff] (!%p367_p2)  ;;  %v1313_v14 = vpack.c.bf16 (!%p367_p2), %v441_v11, %v439_v10  ;;  %v443_v16 = vld [vmem:[%s2143_s1 + $0x40] sm:$0xff] (!%p367_p2)  ;;  %v445_v17 = vld [vmem:[%s2143_s1 + $0x50] sm:$0xff] (!%p367_p2) }
   0x9   : > { %1310 = vmatpush1.bf16.msra.mxu0 (!%p367_p2), %v1309_v8  ;;  %v1315_v15 = vpack.c.bf16 (!%p367_p2), %v446_v13, %v444_v12  ;;  %v448_v18 = vld [vmem:[%s2143_s1 + $0x68] sm:$0xff] (!%p367_p2)  ;;  %v450_v19 = vld [vmem:[%s2143_s1 + $0x78] sm:$0xff] (!%p367_p2)  ;;  %v1317_v20 = vpack.c.bf16 (!%p367_p2), %v445_v17, %v443_v16  ;;  %v447_v22 = vld [vmem:[%s2143_s1 + $0x60] sm:$0xff] (!%p367_p2) }
   0xa   : > { %1312 = vmatprep.subr.bf16.mxu0 (!%p367_p2), %v1311_v9  ;;  %v1319_v21 = vpack.c.bf16 (!%p367_p2), %v450_v19, %v448_v18  ;;  %v449_v23 = vld [vmem:[%s2143_s1 + $0x70] sm:$0xff] (!%p367_p2)  ;;  %v452_v24 = vld [vmem:[%s2143_s1 + $0x88] sm:$0xff] (!%p367_p2)  ;;  %v454_v25 = vld [vmem:[%s2143_s1 + $0x98] sm:$0xff] (!%p367_p2) }
   0xb   : > { %v451_v26 = vld [vmem:[%s2143_s1 + $0x80] sm:$0xff] (!%p367_p2)  ;;  %v453_v27 = vld [vmem:[%s2143_s1 + $0x90] sm:$0xff] (!%p367_p2)  ;;  %v1321_v28 = vpack.c.bf16 (!%p367_p2), %v449_v23, %v447_v22  ;;  %v456_v29 = vld [vmem:[%s2143_s1 + $0xa8] sm:$0xff] (!%p367_p2)  ;;  %v1323_v34 = vpack.c.bf16 (!%p367_p2), %v454_v25, %v452_v24 }
   0xc   : > { %v458_v30 = vld [vmem:[%s2143_s1 + $0xb8] sm:$0xff] (!%p367_p2)  ;;  %v592_v31 = vld [vmem:[%s2145_s3 + $0x80] sm:$0xff] (!%p367_p2)  ;;  %v593_v32 = vld [vmem:[%s2145_s3 + $0x88] sm:$0xff] (!%p367_p2)  ;;  %v1325_v45 = vpack.c.bf16 (!%p367_p2), %v453_v27, %v451_v26 }
   0xd   : > { %1314 = vmatpush1.bf16.msra.mxu0 %v1313_v14  ;;  %v576_v33 = vld [vmem:[%s2145_s3] sm:$0xff]  ;;  %v1339_v35 = vpack.c.bf16 %v593_v32, %v592_v31  ;;  %v577_v36 = vld [vmem:[%s2145_s3 + $0x8] sm:$0xff]  ;;  %v594_v37 = vld [vmem:[%s2145_s3 + $0x90] sm:$0xff]  ;;  %v1327_v49 = vpack.c.bf16 %v458_v30, %v456_v29  ;;  %s2156_s19 = smov (!%p414_p3, %s1670_s19), 7 }
   0xe   : > { %1316 = vmatprep.subr.bf16.mxu0 %v1315_v15  ;;  %v595_v38 = vld [vmem:[%s2145_s3 + $0x98] sm:$0xff]  ;;  %v1341_v39 = vpack.c.bf16 %v577_v36, %v576_v33  ;;  %v578_v41 = vld [vmem:[%s2145_s3 + $0x10] sm:$0xff]  ;;  %v596_v43 = vld [vmem:[%s2145_s3 + $0xa0] sm:$0xff]  ;;  %s1739_s13 = sshll.u32 %s2156_s19, 3 }
   0xf   : > { %v1343_v40 = vpack.c.bf16 %v595_v38, %v594_v37  ;;  %v579_v42 = vld [vmem:[%s2145_s3 + $0x18] sm:$0xff]  ;;  %1340 = vmatprep.subr.bf16.mxu1 %v1339_v35  ;;  %v597_v44 = vld [vmem:[%s2145_s3 + $0xa8] sm:$0xff]  ;;  %v455_v46 = vld [vmem:[%s2143_s1 + $0xa0] sm:$0xff]  ;;  %s417_s23 = scalar_lea.vmem %s2142_s0, %s1739_s13  ;;  %s429_s26 = scalar_lea.vmem %s2154_s12, %s1739_s13 }
  0x10   : > { %v457_v47 = vld [vmem:[%s2143_s1 + $0xb0] sm:$0xff]  ;;  %1342 = vmatpush3.bf16.msra.mxu1 %v1341_v39  ;;  %v1345_v48 = vpack.c.bf16 %v579_v42, %v578_v41  ;;  %v460_v50 = vld [vmem:[%s2143_s1 + $0xc8] sm:$0xff]  ;;  %v1347_v51 = vpack.c.bf16 %v597_v44, %v596_v43  ;;  %v580_v52 = vld [vmem:[%s2145_s3 + $0x20] sm:$0xff] }
  0x11   : > { %1318 = vmatpush1.bf16.msra.mxu0 %v1317_v20  ;;  %1344 = vmatprep.subr.bf16.mxu1 %v1343_v40  ;;  %v581_v53 = vld [vmem:[%s2145_s3 + $0x28] sm:$0xff]  ;;  %v462_v54 = vld [vmem:[%s2143_s1 + $0xd8] sm:$0xff]  ;;  %v598_v55 = vld [vmem:[%s2145_s3 + $0xb0] sm:$0xff]  ;;  %v1329_v57 = vpack.c.bf16 %v457_v47, %v455_v46 }
  0x12   : > { %1320 = vmatprep.subr.bf16.mxu0 %v1319_v21  ;;  %v599_v56 = vld [vmem:[%s2145_s3 + $0xb8] sm:$0xff]  ;;  %v459_v58 = vld [vmem:[%s2143_s1 + $0xc0] sm:$0xff]  ;;  %v461_v59 = vld [vmem:[%s2143_s1 + $0xd0] sm:$0xff]  ;;  %v1349_v60 = vpack.c.bf16 %v581_v53, %v580_v52  ;;  %v1331_v61 = vpack.c.bf16 %v462_v54, %v460_v50 }
  0x13   : > { %v464_v62 = vld [vmem:[%s2143_s1 + $0xe8] sm:$0xff]  ;;  %v1351_v63 = vpack.c.bf16 %v599_v56, %v598_v55  ;;  %v582_v0 = vld [vmem:[%s2145_s3 + $0x30] sm:$0xff]  ;;  %v583_v1 = vld [vmem:[%s2145_s3 + $0x38] sm:$0xff]  ;;  %v1333_v5 = vpack.c.bf16 %v461_v59, %v459_v58 }
  0x14   : > { %1346 = vmatpush3.bf16.msra.mxu1 %v1345_v48  ;;  %v466_v2 = vld [vmem:[%s2143_s1 + $0xf8] sm:$0xff]  ;;  %v600_v3 = vld [vmem:[%s2145_s3 + $0xc0] sm:$0xff]  ;;  %v601_v4 = vld [vmem:[%s2145_s3 + $0xc8] sm:$0xff]  ;;  %v1353_v8 = vpack.c.bf16 %v583_v1, %v582_v0 }
  0x15   : > { %1322 = vmatpush1.bf16.msra.mxu0 %v1321_v28  ;;  %1348 = vmatprep.subr.bf16.mxu1 %v1347_v51  ;;  %v463_v6 = vld [vmem:[%s2143_s1 + $0xe0] sm:$0xff]  ;;  %v1335_v9 = vpack.c.bf16 %v466_v2, %v464_v62  ;;  %v465_v10 = vld [vmem:[%s2143_s1 + $0xf0] sm:$0xff]  ;;  %v1355_v11 = vpack.c.bf16 %v601_v4, %v600_v3  ;;  %v585_v13 = vld [vmem:[%s2145_s3 + $0x48] sm:$0xff] }
  0x16   : > { %1324 = vmatprep.subr.bf16.mxu0 %v1323_v34  ;;  %v584_v12 = vld [vmem:[%s2145_s3 + $0x40] sm:$0xff]  ;;  %v602_v14 = vld [vmem:[%s2145_s3 + $0xd0] sm:$0xff]  ;;  %v603_v15 = vld [vmem:[%s2145_s3 + $0xd8] sm:$0xff]  ;;  %v1337_v16 = vpack.c.bf16 %v465_v10, %v463_v6 }
  0x17   : > { %v1357_v17 = vpack.c.bf16 %v585_v13, %v584_v12  ;;  %v1359_v18 = vpack.c.bf16 %v603_v15, %v602_v14  ;;  %v586_v19 = vld [vmem:[%s2145_s3 + $0x50] sm:$0xff]  ;;  %v587_v20 = vld [vmem:[%s2145_s3 + $0x58] sm:$0xff]  ;;  %v604_v21 = vld [vmem:[%s2145_s3 + $0xe0] sm:$0xff] }
  0x18   : > { %1350 = vmatpush3.bf16.msra.mxu1 %v1349_v60  ;;  %v605_v22 = vld [vmem:[%s2145_s3 + $0xe8] sm:$0xff]  ;;  %v431_v23 = vld [vmem:[%s417_s23] sm:$0xff]  ;;  %v1361_v24 = vpack.c.bf16 %v587_v20, %v586_v19  ;;  %v433_v27 = vld [vmem:[%s417_s23 + $0x10] sm:$0xff] }
  0x19   : > { %1326 = vmatpush1.bf16.msra.mxu0 %v1325_v45  ;;  %1352 = vmatprep.subr.bf16.mxu1 %v1351_v63  ;;  %v1363_v25 = vpack.c.bf16 %v605_v22, %v604_v21  ;;  %v432_v26 = vld [vmem:[%s417_s23 + $0x8] sm:$0xff]  ;;  %v434_v28 = vld [vmem:[%s417_s23 + $0x18] sm:$0xff]  ;;  %v588_v29 = vld [vmem:[%s2145_s3 + $0x60] sm:$0xff]  ;;  %s2095_s23 = scalar_lea.vmem %s2153_s11, %s1739_s13 }
  0x1a   : > { %1328 = vmatprep.subr.bf16.mxu0 %v1327_v49  ;;  %v589_v30 = vld [vmem:[%s2145_s3 + $0x68] sm:$0xff]  ;;  %v606_v32 = vld [vmem:[%s2145_s3 + $0xf0] sm:$0xff]  ;;  %v607_v33 = vld [vmem:[%s2145_s3 + $0xf8] sm:$0xff] }
  0x1b   : > { %v1365_v31 = vpack.c.bf16 %v589_v30, %v588_v29  ;;  %v1367_v34 = vpack.c.bf16 %v607_v33, %v606_v32  ;;  %v590_v35 = vld [vmem:[%s2145_s3 + $0x70] sm:$0xff]  ;;  %v591_v36 = vld [vmem:[%s2145_s3 + $0x78] sm:$0xff]  ;;  %v705_v38 = vld [vmem:[%s2147_s5 + $0x8] sm:$0xff] }
  0x1c   : > { %1354 = vmatpush3.bf16.msra.mxu1 %v1353_v8  ;;  %v1369_v37 = vpack.c.bf16 %v591_v36, %v590_v35  ;;  %v707_v39 = vld [vmem:[%s2147_s5 + $0x18] sm:$0xff]  ;;  %v704_v40 = vld [vmem:[%s2147_s5] sm:$0xff]  ;;  %v706_v42 = vld [vmem:[%s2147_s5 + $0x10] sm:$0xff] }
  0x1d   : > { %1330 = vmatpush1.bf16.msra.mxu0 %v1329_v57  ;;  %1356 = vmatprep.subr.bf16.mxu1 %v1355_v11  ;;  %v1371_v41 = vpack.c.bf16 %v707_v39, %v705_v38  ;;  %v709_v43 = vld [vmem:[%s2147_s5 + $0x28] sm:$0xff]  ;;  %v711_v44 = vld [vmem:[%s2147_s5 + $0x38] sm:$0xff]  ;;  %v1373_v45 = vpack.c.bf16 %v706_v42, %v704_v40  ;;  %v708_v47 = vld [vmem:[%s2147_s5 + $0x20] sm:$0xff]  ;;  %v469_v11 = vlaneseq }
  0x1e   : > { %1332 = vmatprep.subr.bf16.mxu0 %v1331_v61  ;;  %v1375_v46 = vpack.c.bf16 %v711_v44, %v709_v43  ;;  %v710_v48 = vld [vmem:[%s2147_s5 + $0x30] sm:$0xff]  ;;  %v713_v49 = vld [vmem:[%s2147_s5 + $0x48] sm:$0xff]  ;;  %v715_v50 = vld [vmem:[%s2147_s5 + $0x58] sm:$0xff] }
  0x1f   : > { %v1377_v51 = vpack.c.bf16 %v710_v48, %v708_v47  ;;  %v1379_v52 = vpack.c.bf16 %v715_v50, %v713_v49  ;;  %v712_v53 = vld [vmem:[%s2147_s5 + $0x40] sm:$0xff]  ;;  %v714_v54 = vld [vmem:[%s2147_s5 + $0x50] sm:$0xff]  ;;  %v717_v55 = vld [vmem:[%s2147_s5 + $0x68] sm:$0xff]  ;;  %v470_v12 = vshrl.u32 %v469_v11, 7 }
  0x20   : > { %1358 = vmatpush3.bf16.msra.mxu1 %v1357_v17  ;;  %v719_v56 = vld [vmem:[%s2147_s5 + $0x78] sm:$0xff]  ;;  %v1381_v57 = vpack.c.bf16 %v714_v54, %v712_v53  ;;  %v716_v59 = vld [vmem:[%s2147_s5 + $0x60] sm:$0xff]  ;;  %v718_v60 = vld [vmem:[%s2147_s5 + $0x70] sm:$0xff] }
  0x21   : > { %1334 = vmatpush1.bf16.msra.mxu0 %v1333_v5  ;;  %1360 = vmatprep.subr.bf16.mxu1 %v1359_v18  ;;  %v1383_v58 = vpack.c.bf16 %v719_v56, %v717_v55  ;;  %v721_v61 = vld [vmem:[%s2147_s5 + $0x88] sm:$0xff]  ;;  %v723_v62 = vld [vmem:[%s2147_s5 + $0x98] sm:$0xff]  ;;  %v1385_v63 = vpack.c.bf16 %v718_v60, %v716_v59  ;;  %v720_v1 = vld [vmem:[%s2147_s5 + $0x80] sm:$0xff]  ;;  %v1857_v13 = vsub.s32 0, %v470_v12  ;;  %v1862_v15 = vsub.s32 1, %v470_v12 }
  0x22   : > { %1336 = vmatprep.subr.bf16.mxu0 %v1335_v9  ;;  %v1387_v0 = vpack.c.bf16 %v723_v62, %v721_v61  ;;  %v722_v2 = vld [vmem:[%s2147_s5 + $0x90] sm:$0xff]  ;;  %v725_v3 = vld [vmem:[%s2147_s5 + $0xa8] sm:$0xff]  ;;  %v727_v4 = vld [vmem:[%s2147_s5 + $0xb8] sm:$0xff] }
  0x23   : > { %v1389_v5 = vpack.c.bf16 %v722_v2, %v720_v1  ;;  %v1391_v6 = vpack.c.bf16 %v727_v4, %v725_v3  ;;  %v724_v8 = vld [vmem:[%s2147_s5 + $0xa0] sm:$0xff]  ;;  %v726_v9 = vld [vmem:[%s2147_s5 + $0xb0] sm:$0xff]  ;;  %v729_v42 = vld [vmem:[%s2147_s5 + $0xc8] sm:$0xff] }
  0x24   : > { %1362 = vmatpush3.bf16.msra.mxu1 %v1361_v24  ;;  %v1393_v10 = vpack.c.bf16 %v726_v9, %v724_v8  ;;  %v467_v14 = vld [vmem:[%s2144_s2] sm:$0x3]  ;;  %v731_v43 = vld [vmem:[%s2147_s5 + $0xd8] sm:$0xff]  ;;  %v733_v48 = vld [vmem:[%s2147_s5 + $0xe8] sm:$0xff] }
  0x25   : > { %1338 = vmatpush1.bf16.msra.mxu0 %v1337_v16  ;;  %1364 = vmatprep.subr.bf16.mxu1 %v1363_v25  ;;  %v472_v16 = vrot.slane %v467_v14, %v1857_v13  ;;  %v476_v17 = vrot.slane %v467_v14, %v1862_v15  ;;  %v1395_v44 = vpack.c.bf16 %v731_v43, %v729_v42  ;;  %v735_v49 = vld [vmem:[%s2147_s5 + $0xf8] sm:$0xff]  ;;  %v846_v54 = vld [vmem:[%s2149_s7 + $0x8] sm:$0xff]  ;;  %v845_v56 = vld [vmem:[%s2149_s7] sm:$0xff] }
  0x26   : > { %1372 = vmatprep.subr.bf16.mxu0 %v1371_v41  ;;  %v1399_v50 = vpack.c.bf16 %v735_v49, %v733_v48  ;;  %v848_v55 = vld [vmem:[%s2149_s7 + $0x18] sm:$0xff]  ;;  %v850_v59 = vld [vmem:[%s2149_s7 + $0x28] sm:$0xff]  ;;  %v857_v12 = vld [vmem:[%s2149_s7 + $0x60] sm:$0xff] }
  0x27   : > { %v852_v60 = vld [vmem:[%s2149_s7 + $0x38] sm:$0xff]  ;;  %v854_v1 = vld [vmem:[%s2149_s7 + $0x48] sm:$0xff]  ;;  %v859_v14 = vld [vmem:[%s2149_s7 + $0x70] sm:$0xff] }
  0x28   : > { %544 = vmatmul.mubr.f32.vlgmr.msra.gmra.mrb[0].mxu0 %v431_v23  ;;  %1366 = vmatpush3.bf16.msra.mxu1 %v1365_v31  ;;  %v1407_v62 = vpack.c.bf16 %v852_v60, %v850_v59  ;;  %v856_v2 = vld [vmem:[%s2149_s7 + $0x58] sm:$0xff]  ;;  %v858_v8 = vld [vmem:[%s2149_s7 + $0x68] sm:$0xff]  ;;  %v873_v59 = vld [vmem:[%s2149_s7 + $0xe0] sm:$0xff] }
  0x29   : > { %549 = vmatprep.mubr.f32.mxu0 %v1500_v7  ;;  %1368 = vmatprep.subr.bf16.mxu1 %v1367_v34  ;;  %v1411_v4 = vpack.c.bf16 %v856_v2, %v854_v1  ;;  %v860_v9 = vld [vmem:[%s2149_s7 + $0x78] sm:$0xff]  ;;  %v875_v60 = vld [vmem:[%s2149_s7 + $0xf0] sm:$0xff]  ;;  %v987_v2 = vld [vmem:[%s2151_s9 + $0x8] sm:$0xff] }
  0x2a   : > { %1374 = vmatpush1.bf16.msra.mxu0 %v1373_v45  ;;  %v728_v45 = vld [vmem:[%s2147_s5 + $0xc0] sm:$0xff]  ;;  %v1415_v11 = vpack.c.bf16 %v860_v9, %v858_v8  ;;  %v988_v8 = vld [vmem:[%s2151_s9 + $0x10] sm:$0xff]  ;;  %v989_v9 = vld [vmem:[%s2151_s9 + $0x18] sm:$0xff] }
  0x2b   : > { %1376 = vmatprep.subr.bf16.mxu0 %v1375_v46  ;;  %v730_v46 = vld [vmem:[%s2147_s5 + $0xd0] sm:$0xff] }
  0x2c   : > { %550 = vmatmul.mubr.f32.gmra.mrb[2].mxu0 %v432_v26  ;;  %1370 = vmatpush3.bf16.msra.mxu1 %v1369_v37  ;;  %v1397_v47 = vpack.c.bf16 %v730_v46, %v728_v45 }
  0x2d   : > { %555 = vmatprep.mubr.f32.mxu0 %v1500_v7 }
  0x2e   : > { %1378 = vmatpush1.bf16.msra.mxu0 %v1377_v51  ;;  %v732_v51 = vld [vmem:[%s2147_s5 + $0xe0] sm:$0xff] }
  0x2f   : > { %1380 = vmatprep.subr.bf16.mxu0 %v1379_v52  ;;  %v734_v52 = vld [vmem:[%s2147_s5 + $0xf0] sm:$0xff] }
  0x30   : > { %556 = vmatmul.mubr.f32.gmra.mrb[4].mxu0 %v433_v27  ;;  %v1401_v53 = vpack.c.bf16 %v734_v52, %v732_v51 }
  0x31   : > { %561 = vmatprep.mubr.f32.mxu0 %v1500_v7 }
  0x32   : > { %1382 = vmatpush1.bf16.msra.mxu0 %v1381_v57  ;;  %v1403_v57 = vpack.c.bf16 %v848_v55, %v846_v54 }
  0x33   : > { %1384 = vmatprep.subr.bf16.mxu0 %v1383_v58  ;;  %v847_v58 = vld [vmem:[%s2149_s7 + $0x10] sm:$0xff] }
  0x34   : > { %562 = vmatmul.mubr.f32.gmra.mrb[6].mxu0 %v434_v28  ;;  %v1405_v61 = vpack.c.bf16 %v847_v58, %v845_v56  ;;  %1404 = vmatprep.subr.bf16.mxu1 %v1403_v57  ;;  %v874_v56 = vld [vmem:[%s2149_s7 + $0xe8] sm:$0xff]  ;;  %v876_v57 = vld [vmem:[%s2149_s7 + $0xf8] sm:$0xff] }
  0x35   : > { %812 = vmatprep.mubr.f32.mxu0 %v1500_v7  ;;  %v1431_v58 = vpack.c.bf16 %v876_v57, %v874_v56 }
  0x36   : > { %1386 = vmatpush1.bf16.msra.mxu0 %v1385_v63  ;;  %v849_v63 = vld [vmem:[%s2149_s7 + $0x20] sm:$0xff] }
  0x37   : > { %1388 = vmatprep.subr.bf16.mxu0 %v1387_v0  ;;  %v851_v0 = vld [vmem:[%s2149_s7 + $0x30] sm:$0xff] }
  0x38   : > { %v1409_v3 = vpack.c.bf16 %v851_v0, %v849_v63  ;;  %v1003_v63 = vld [vmem:[%s2151_s9 + $0x88] sm:$0xff]  ;;  %v986_v0 = vld [vmem:[%s2151_s9] sm:$0xff] }
  0x3a   : > { %1390 = vmatpush1.bf16.msra.mxu0 %v1389_v5  ;;  %v853_v5 = vld [vmem:[%s2149_s7 + $0x40] sm:$0xff] }
  0x3b   : > { %1392 = vmatprep.subr.bf16.mxu0 %v1391_v6  ;;  %v855_v6 = vld [vmem:[%s2149_s7 + $0x50] sm:$0xff] }
  0x3e   : > { %1394 = vmatpush1.bf16.msra.mxu0 %v1393_v10  ;;  %v1413_v10 = vpack.c.bf16 %v855_v6, %v853_v5  ;;  %v1437_v5 = vpack.c.bf16 %v987_v2, %v986_v0  ;;  %v1017_v2 = vld [vmem:[%s2151_s9 + $0xf8] sm:$0xff] }
  0x3f   : > { %1396 = vmatprep.subr.bf16.mxu0 %v1395_v44 }
  0x42   : > { %1398 = vmatpush1.bf16.msra.mxu0 %v1397_v47 }
  0x43   : > { %1400 = vmatprep.subr.bf16.mxu0 %v1399_v50 }
  0x46   : > { %1402 = vmatpush1.bf16.msra.mxu0 %v1401_v53 }
  0xfb   : > { %v545_v18 = vpop.f32.mrb[0].mxu0 }
  0xfc   : > { %v546_v19 = vadd.f32 %v545_v18, %v472_v16  ;;  %v547_v20 = vpop.f32.mrb[1].mxu0  ;;  %v1417_v18 = vpack.c.bf16 %v859_v14, %v857_v12  ;;  %v2025_v12 = vpack.c.bf16 %v989_v9, %v988_v8  ;;  %v877_v8 = vld [vmem:[%s2150_s8] sm:$0x3] }
  0xfd   : > { %v548_v21 = vadd.f32 %v547_v20, %v476_v17  ;;  %v861_v20 = vld [vmem:[%s2149_s7 + $0x80] sm:$0xff]  ;;  %v882_v9 = vrot.slane %v877_v8, %v1857_v13 }
  0xfe   : > { %v568_v24 = vmax.f32 %v546_v19, 0.0 }
  0xff   : > { %v551_v22 = vpop.f32.mrb[2].mxu0  ;;  %v569_v23 = vmax.f32 %v548_v21, 0.0  ;;  %v863_v21 = vld [vmem:[%s2149_s7 + $0x90] sm:$0xff] }
 0x100   : > { %v552_v25 = vadd.f32 %v551_v22, %v472_v16  ;;  %v553_v26 = vpop.f32.mrb[3].mxu0  ;;  %v866_v22 = vld [vmem:[%s2149_s7 + $0xa8] sm:$0xff] }
 0x101   : > { %v554_v27 = vadd.f32 %v553_v26, %v476_v17  ;;  %679 = vmatprep.mubr.f32.mxu1 %v569_v23  ;;  %v868_v23 = vld [vmem:[%s2149_s7 + $0xb8] sm:$0xff]  ;;  %v865_v26 = vld [vmem:[%s2149_s7 + $0xa0] sm:$0xff] }
 0x102   : > { %680 = vmatmul.mubr.f32.vlgmr.msra.gmra.mrb[0].mxu1 %v568_v24  ;;  %v570_v30 = vmax.f32 %v552_v25, 0.0  ;;  %v1421_v24 = vpack.c.bf16 %v863_v21, %v861_v20  ;;  %v1423_v25 = vpack.c.bf16 %v868_v23, %v866_v22  ;;  %v992_v22 = vld [vmem:[%s2151_s9 + $0x30] sm:$0xff]  ;;  %v993_v23 = vld [vmem:[%s2151_s9 + $0x38] sm:$0xff] }
 0x103   : > { %v571_v28 = vmax.f32 %v554_v27, 0.0  ;;  %v557_v29 = vpop.f32.mrb[4].mxu0  ;;  %1406 = vmatpush1.bf16.msra.mxu1 %v1405_v61  ;;  %v867_v27 = vld [vmem:[%s2149_s7 + $0xb0] sm:$0xff]  ;;  %v1433_v61 = vpack.c.bf16 %v875_v60, %v873_v59 }
 0x104   : > { %v558_v31 = vadd.f32 %v557_v29, %v472_v16  ;;  %v559_v32 = vpop.f32.mrb[5].mxu0  ;;  %1408 = vmatprep.subr.bf16.mxu1 %v1407_v62  ;;  %v872_v29 = vld [vmem:[%s2149_s7 + $0xd8] sm:$0xff]  ;;  %v1002_v62 = vld [vmem:[%s2151_s9 + $0x80] sm:$0xff] }
 0x105   : > { %v560_v33 = vadd.f32 %v559_v32, %v476_v17  ;;  %684 = vmatprep.mubr.f32.mxu1 %v571_v28  ;;  %v870_v28 = vld [vmem:[%s2149_s7 + $0xc8] sm:$0xff]  ;;  %v869_v32 = vld [vmem:[%s2149_s7 + $0xc0] sm:$0xff]  ;;  %v1435_v1 = vpack.c.bf16 %v1003_v63, %v1002_v62 }
 0x106   : > { %685 = vmatmul.mubr.f32.gmra.mrb[2].mxu1 %v570_v30  ;;  %v572_v36 = vmax.f32 %v558_v31, 0.0  ;;  %v1425_v30 = vpack.c.bf16 %v867_v27, %v865_v26  ;;  %v1427_v31 = vpack.c.bf16 %v872_v29, %v870_v28  ;;  %v1449_v26 = vpack.c.bf16 %v993_v23, %v992_v22  ;;  %v994_v28 = vld [vmem:[%s2151_s9 + $0x40] sm:$0xff]  ;;  %v995_v29 = vld [vmem:[%s2151_s9 + $0x48] sm:$0xff] }
 0x107   : > { %v573_v34 = vmax.f32 %v560_v33, 0.0  ;;  %v563_v35 = vpop.f32.mrb[6].mxu0  ;;  %1410 = vmatpush1.bf16.msra.mxu1 %v1409_v3  ;;  %v871_v33 = vld [vmem:[%s2149_s7 + $0xd0] sm:$0xff]  ;;  %1436 = vmatprep.subr.bf16.mxu0 %v1435_v1  ;;  %v998_v63 = vld [vmem:[%s2151_s9 + $0x60] sm:$0xff] }
 0x108   : > { %v564_v37 = vadd.f32 %v563_v35, %v472_v16  ;;  %v565_v38 = vpop.f32.mrb[7].mxu0  ;;  %1412 = vmatprep.subr.bf16.mxu1 %v1411_v4  ;;  %v862_v16 = vld [vmem:[%s2149_s7 + $0x88] sm:$0xff]  ;;  %v1004_v3 = vld [vmem:[%s2151_s9 + $0x90] sm:$0xff]  ;;  %v1005_v4 = vld [vmem:[%s2151_s9 + $0x98] sm:$0xff] }
 0x109   : > { %v566_v39 = vadd.f32 %v565_v38, %v476_v17  ;;  %689 = vmatprep.mubr.f32.mxu1 %v573_v34  ;;  %v864_v17 = vld [vmem:[%s2149_s7 + $0x98] sm:$0xff]  ;;  %v1429_v34 = vpack.c.bf16 %v871_v33, %v869_v32  ;;  %v2011_v6 = vpack.c.bf16 %v1005_v4, %v1004_v3  ;;  %v1453_v32 = vpack.c.bf16 %v995_v29, %v994_v28  ;;  %v1000_v4 = vld [vmem:[%s2151_s9 + $0x70] sm:$0xff] }
 0x10a   : > { %690 = vmatmul.mubr.f32.gmra.mrb[4].mxu1 %v572_v36  ;;  %v574_v41 = vmax.f32 %v564_v37, 0.0  ;;  %v1419_v19 = vpack.c.bf16 %v864_v17, %v862_v16  ;;  %v1215_v36 = vld [vmem:[%s2146_s4] ss:$0 sm:$0xff]  ;;  %v991_v17 = vld [vmem:[%s2151_s9 + $0x28] sm:$0xff] }
 0x10b   : > { %v575_v40 = vmax.f32 %v566_v39, 0.0  ;;  %1414 = vmatpush1.bf16.msra.mxu1 %v1413_v10  ;;  %v1006_v10 = vld [vmem:[%s2151_s9 + $0xa0] sm:$0xff] }
 0x10c   : > { %1416 = vmatprep.subr.bf16.mxu1 %v1415_v11  ;;  %v1007_v11 = vld [vmem:[%s2151_s9 + $0xa8] sm:$0xff]  ;;  %v990_v16 = vld [vmem:[%s2151_s9 + $0x20] sm:$0xff] }
 0x10d   : > { %694 = vmatprep.mubr.f32.mxu1 %v575_v40  ;;  %v2028_v14 = vpack.c.bf16 %v1007_v11, %v1006_v10  ;;  %v2043_v20 = vpack.c.bf16 %v991_v17, %v990_v16  ;;  %v886_v10 = vrot.slane %v877_v8, %v1862_v15 }
 0x10e   : > { %695 = vmatmul.mubr.f32.gmra.mrb[6].mxu1 %v574_v41 }
 0x10f   : > { %953 = vmatprep.mubr.f32.mxu1 %v1500_v7  ;;  %1418 = vmatpush1.bf16.msra.mxu1 %v1417_v18  ;;  %v1008_v18 = vld [vmem:[%s2151_s9 + $0xb0] sm:$0xff] }
 0x110   : > { %1420 = vmatprep.subr.bf16.mxu1 %v1419_v19  ;;  %v1009_v19 = vld [vmem:[%s2151_s9 + $0xb8] sm:$0xff] }
 0x111   : > { %v2046_v21 = vpack.c.bf16 %v1009_v19, %v1008_v18 }
 0x113   : > { %1422 = vmatpush1.bf16.msra.mxu1 %v1421_v24  ;;  %v1010_v24 = vld [vmem:[%s2151_s9 + $0xc0] sm:$0xff] }
 0x114   : > { %1424 = vmatprep.subr.bf16.mxu1 %v1423_v25  ;;  %v1011_v25 = vld [vmem:[%s2151_s9 + $0xc8] sm:$0xff] }
 0x115   : > { %v1451_v27 = vpack.c.bf16 %v1011_v25, %v1010_v24 }
 0x117   : > { %1426 = vmatpush1.bf16.msra.mxu1 %v1425_v30  ;;  %v1012_v30 = vld [vmem:[%s2151_s9 + $0xd0] sm:$0xff] }
 0x118   : > { %1428 = vmatprep.subr.bf16.mxu1 %v1427_v31  ;;  %v1013_v31 = vld [vmem:[%s2151_s9 + $0xd8] sm:$0xff] }
 0x119   : > { %v1455_v33 = vpack.c.bf16 %v1013_v31, %v1012_v30 }
 0x11b   : > { %1430 = vmatpush1.bf16.msra.mxu1 %v1429_v34  ;;  %v996_v34 = vld [vmem:[%s2151_s9 + $0x50] sm:$0xff] }
 0x11c   : > { %1432 = vmatprep.subr.bf16.mxu1 %v1431_v58 }
 0x11f   : > { %1434 = vmatpush1.bf16.msra.mxu1 %v1433_v61 }
 0x120   : > { %1467 = vmatprep.subr.bf16.mxu1 %v1435_v1  ;;  %v1016_v1 = vld [vmem:[%s2151_s9 + $0xf0] sm:$0xff] }
 0x121   : > { %v1463_v3 = vpack.c.bf16 %v1017_v2, %v1016_v1 }
 0x1d5   : > { %v1251_v35 = vpop.f32.mrb[0].mxu1 }
 0x1d6   : > { %v1252_v37 = vpop.f32.mrb[1].mxu1 }
 0x1d7   : > { %v1253_v38 = vadd.f32 %v1252_v37, %v1251_v35  ;;  %v997_v35 = vld [vmem:[%s2151_s9 + $0x58] sm:$0xff]  ;;  %v1015_v37 = vld [vmem:[%s2151_s9 + $0xe8] sm:$0xff] }
 0x1d9   : > { %v682_v39 = vadd.f32 %v1253_v38, %v1215_v36  ;;  %v1254_v40 = vpop.f32.mrb[2].mxu1  ;;  %v1457_v38 = vpack.c.bf16 %v997_v35, %v996_v34 }
 0x1da   : > { %v1255_v41 = vpop.f32.mrb[3].mxu1 }
 0x1db   : > { %v700_v42 = vmax.f32 %v682_v39, 0.0  ;;  %v1256_v43 = vadd.f32 %v1255_v41, %v1254_v40  ;;  %v736_v40 = vld [vmem:[%s2148_s6] sm:$0x3] }
 0x1dc   : > { %v741_v41 = vrot.slane %v736_v40, %v1857_v13 }
 0x1dd   : > { %v687_v44 = vadd.f32 %v1256_v43, %v1215_v36  ;;  %v1257_v45 = vpop.f32.mrb[4].mxu1  ;;  %813 = vmatmul.mubr.f32.vlgmr.msra.gmra.mrb[8].mxu0 %v700_v42  ;;  %v745_v42 = vrot.slane %v736_v40, %v1862_v15 }
 0x1de   : > { %v1258_v46 = vpop.f32.mrb[5].mxu1  ;;  %818 = vmatprep.mubr.f32.mxu0 %v1500_v7  ;;  %1438 = vmatpush3.bf16.msra.mxu0 %v1437_v5 }
 0x1df   : > { %v701_v47 = vmax.f32 %v687_v44, 0.0  ;;  %v1259_v48 = vadd.f32 %v1258_v46, %v1257_v45  ;;  %1440 = vmatprep.subr.bf16.mxu0 %v2011_v6 }
 0x1e1   : > { %v692_v49 = vadd.f32 %v1259_v48, %v1215_v36  ;;  %v1260_v50 = vpop.f32.mrb[6].mxu1  ;;  %819 = vmatmul.mubr.f32.gmra.mrb[10].mxu0 %v701_v47 }
 0x1e2   : > { %v1261_v51 = vpop.f32.mrb[7].mxu1  ;;  %824 = vmatprep.mubr.f32.mxu0 %v1500_v7  ;;  %1442 = vmatpush3.bf16.msra.mxu0 %v2025_v12 }
 0x1e3   : > { %v702_v52 = vmax.f32 %v692_v49, 0.0  ;;  %v1262_v53 = vadd.f32 %v1261_v51, %v1260_v50  ;;  %1444 = vmatprep.subr.bf16.mxu0 %v2028_v14 }
 0x1e5   : > { %v697_v54 = vadd.f32 %v1262_v53, %v1215_v36  ;;  %825 = vmatmul.mubr.f32.gmra.mrb[12].mxu0 %v702_v52  ;;  %v1014_v36 = vld [vmem:[%s2151_s9 + $0xe0] sm:$0xff] }
 0x1e6   : > { %830 = vmatprep.mubr.f32.mxu0 %v1500_v7  ;;  %1446 = vmatpush3.bf16.msra.mxu0 %v2043_v20  ;;  %v1459_v39 = vpack.c.bf16 %v1015_v37, %v1014_v36  ;;  %v1216_v36 = vld [vmem:[%s2152_s10] ss:$0 sm:$0xff] }
 0x1e7   : > { %v703_v55 = vmax.f32 %v697_v54, 0.0  ;;  %1448 = vmatprep.subr.bf16.mxu0 %v2046_v21 }
 0x1e9   : > { %831 = vmatmul.mubr.f32.gmra.mrb[14].mxu0 %v703_v55 }
 0x1ea   : > { %1450 = vmatpush3.bf16.msra.mxu0 %v1449_v26 }
 0x1eb   : > { %1452 = vmatprep.subr.bf16.mxu0 %v1451_v27 }
 0x1ee   : > { %1454 = vmatpush3.bf16.msra.mxu0 %v1453_v32 }
 0x1ef   : > { %1456 = vmatprep.subr.bf16.mxu0 %v1455_v33 }
 0x1f2   : > { %1458 = vmatpush3.bf16.msra.mxu0 %v1457_v38 }
 0x1f3   : > { %1460 = vmatprep.subr.bf16.mxu0 %v1459_v39 }
 0x2b0   : > { %v814_v43 = vpop.f32.mrb[8].mxu0 }
 0x2b1   : > { %v815_v44 = vadd.f32 %v814_v43, %v741_v41  ;;  %v816_v45 = vpop.f32.mrb[9].mxu0 }
 0x2b2   : > { %v817_v46 = vadd.f32 %v816_v45, %v745_v42 }
 0x2b3   : > { %837 = vst [vmem:[%s2095_s23] sm:$0xff] %v815_v44 }
 0x2b4   : > { %v841_v47 = vmax.f32 %v817_v46, 0.0  ;;  %v820_v48 = vpop.f32.mrb[10].mxu0 }
 0x2b5   : > { %v821_v49 = vadd.f32 %v820_v48, %v741_v41  ;;  %v822_v50 = vpop.f32.mrb[11].mxu0 }
 0x2b6   : > { %v823_v51 = vadd.f32 %v822_v50, %v745_v42  ;;  %954 = vmatmul.mubr.f32.vlgmr.msra.gmra.mrb[8].mxu1 %v841_v47 }
 0x2b7   : > { %838 = vst [vmem:[%s2095_s23 + $0x8] sm:$0xff] %v821_v49  ;;  %959 = vmatprep.mubr.f32.mxu1 %v1500_v7  ;;  %1475 = vmatpush3.bf16.msra.mxu1 %v1437_v5  ;;  %v1001_v5 = vld [vmem:[%s2151_s9 + $0x78] sm:$0xff] }
 0x2b8   : > { %v842_v52 = vmax.f32 %v823_v51, 0.0  ;;  %v826_v53 = vpop.f32.mrb[12].mxu0  ;;  %1468 = vmatprep.subr.bf16.mxu1 %v2011_v6  ;;  %v1465_v6 = vpack.c.bf16 %v1001_v5, %v1000_v4 }
 0x2b9   : > { %v827_v54 = vadd.f32 %v826_v53, %v741_v41  ;;  %v828_v55 = vpop.f32.mrb[13].mxu0 }
 0x2ba   : > { %v829_v56 = vadd.f32 %v828_v55, %v745_v42  ;;  %960 = vmatmul.mubr.f32.gmra.mrb[10].mxu1 %v842_v52 }
 0x2bb   : > { %839 = vst [vmem:[%s2095_s23 + $0x10] sm:$0xff] %v827_v54  ;;  %965 = vmatprep.mubr.f32.mxu1 %v1500_v7  ;;  %1476 = vmatpush3.bf16.msra.mxu1 %v2025_v12 }
 0x2bc   : > { %v843_v57 = vmax.f32 %v829_v56, 0.0  ;;  %v832_v58 = vpop.f32.mrb[14].mxu0  ;;  %1469 = vmatprep.subr.bf16.mxu1 %v2028_v14 }
 0x2bd   : > { %v833_v59 = vadd.f32 %v832_v58, %v741_v41  ;;  %v834_v60 = vpop.f32.mrb[15].mxu0 }
 0x2be   : > { %v835_v61 = vadd.f32 %v834_v60, %v745_v42  ;;  %966 = vmatmul.mubr.f32.gmra.mrb[12].mxu1 %v843_v57 }
 0x2bf   : > { %840 = vst [vmem:[%s2095_s23 + $0x18] sm:$0xff] %v833_v59  ;;  %971 = vmatprep.mubr.f32.mxu1 %v1500_v7  ;;  %1477 = vmatpush3.bf16.msra.mxu1 %v2043_v20  ;;  %v999_v7 = vld [vmem:[%s2151_s9 + $0x68] sm:$0xff] }
 0x2c0   : > { %v844_v62 = vmax.f32 %v835_v61, 0.0  ;;  %1470 = vmatprep.subr.bf16.mxu1 %v2046_v21  ;;  %v1461_v0 = vpack.c.bf16 %v999_v7, %v998_v63 }
 0x2c2   : > { %972 = vmatmul.mubr.f32.gmra.mrb[14].mxu1 %v844_v62  ;;  %1462 = vmatpush3.bf16.msra.mxu0 %v1461_v0 }
 0x2c3   : > { %1478 = vmatpush3.bf16.msra.mxu1 %v1449_v26  ;;  %1464 = vmatprep.subr.bf16.mxu0 %v1463_v3 }
 0x2c4   : > { %1471 = vmatprep.subr.bf16.mxu1 %v1451_v27 }
 0x2c6   : > { %1466 = vmatpush3.bf16.msra.mxu0 %v1465_v6 }
 0x2c7   : > { %1479 = vmatpush3.bf16.msra.mxu1 %v1453_v32 }
 0x2c8   : > { %1472 = vmatprep.subr.bf16.mxu1 %v1455_v33 }
 0x2cb   : > { %1480 = vmatpush3.bf16.msra.mxu1 %v1457_v38 }
 0x2cc   : > { %1473 = vmatprep.subr.bf16.mxu1 %v1459_v39 }
 0x2cf   : > { %1481 = vmatpush3.bf16.msra.mxu1 %v1461_v0 }
 0x2d0   : > { %1474 = vmatprep.subr.bf16.mxu1 %v1463_v3 }
 0x2d3   : > { %1482 = vmatpush3.bf16.msra.mxu1 %v1465_v6 }
 0x389   : > { %v955_v11 = vpop.f32.mrb[8].mxu1 }
 0x38a   : > { %v956_v12 = vadd.f32 %v955_v11, %v882_v9  ;;  %v957_v14 = vpop.f32.mrb[9].mxu1 }
 0x38b   : > { %v958_v16 = vadd.f32 %v957_v14, %v886_v10 }
 0x38c   : > { %v978_v19 = vmax.f32 %v956_v12, 0.0 }
 0x38d   : > { %v979_v17 = vmax.f32 %v958_v16, 0.0  ;;  %v961_v18 = vpop.f32.mrb[10].mxu1 }
 0x38e   : > { %v962_v20 = vadd.f32 %v961_v18, %v882_v9  ;;  %v963_v21 = vpop.f32.mrb[11].mxu1 }
 0x38f   : > { %v964_v22 = vadd.f32 %v963_v21, %v886_v10  ;;  %1089 = vmatprep.mubr.f32.mxu0 %v979_v17 }
 0x390   : > { %1090 = vmatmul.mubr.f32.vlgmr.msra.gmra.mrb[16].mxu0 %v978_v19  ;;  %v980_v25 = vmax.f32 %v962_v20, 0.0 }
 0x391   : > { %v981_v23 = vmax.f32 %v964_v22, 0.0  ;;  %v967_v24 = vpop.f32.mrb[12].mxu1 }
 0x392   : > { %v968_v26 = vadd.f32 %v967_v24, %v882_v9  ;;  %v969_v27 = vpop.f32.mrb[13].mxu1 }
 0x393   : > { %v970_v13 = vadd.f32 %v969_v27, %v886_v10  ;;  %1094 = vmatprep.mubr.f32.mxu0 %v981_v23 }
 0x394   : > { %1095 = vmatmul.mubr.f32.gmra.mrb[18].mxu0 %v980_v25  ;;  %v982_v29 = vmax.f32 %v968_v26, 0.0 }
 0x395   : > { %v983_v15 = vmax.f32 %v970_v13, 0.0  ;;  %v973_v28 = vpop.f32.mrb[14].mxu1 }
 0x396   : > { %v974_v30 = vadd.f32 %v973_v28, %v882_v9  ;;  %v975_v31 = vpop.f32.mrb[15].mxu1 }
 0x397   : > { %v976_v32 = vadd.f32 %v975_v31, %v886_v10  ;;  %1099 = vmatprep.mubr.f32.mxu1 %v983_v15 }
 0x398   : > { %1100 = vmatmul.mubr.f32.vlgmr.msra.gmra.mrb[16].mxu1 %v982_v29  ;;  %v984_v34 = vmax.f32 %v974_v30, 0.0 }
 0x399   : > { %v985_v33 = vmax.f32 %v976_v32, 0.0 }
 0x39b   : > { %1104 = vmatprep.mubr.f32.mxu1 %v985_v33 }
 0x39c   : > { %1105 = vmatmul.mubr.f32.gmra.mrb[18].mxu1 %v984_v34 }
 0x463   : > { %v1295_v35 = vpop.f32.mrb[16].mxu0 }
 0x464   : > { %v1296_v37 = vpop.f32.mrb[17].mxu0 }
 0x465   : > { %v1297_v38 = vadd.f32 %v1296_v37, %v1295_v35 }
 0x467   : > { %v1092_v39 = vadd.f32 %v1297_v38, %v1216_v36  ;;  %v1298_v40 = vpop.f32.mrb[18].mxu0 }
 0x468   : > { %v1299_v41 = vpop.f32.mrb[19].mxu0 }
 0x469   : > { %1110 = vst [vmem:[%s429_s26] sm:$0xff] %v1092_v39  ;;  %v1300_v42 = vadd.f32 %v1299_v41, %v1298_v40 }
 0x46b   : > { %v1097_v43 = vadd.f32 %v1300_v42, %v1216_v36  ;;  %v1301_v44 = vpop.f32.mrb[16].mxu1 }
 0x46c   : > { %v1302_v45 = vpop.f32.mrb[17].mxu1 }
 0x46d   : > { %1111 = vst [vmem:[%s429_s26 + $0x8] sm:$0xff] %v1097_v43  ;;  %v1303_v46 = vadd.f32 %v1302_v45, %v1301_v44 }
 0x46f   : > { %v1102_v47 = vadd.f32 %v1303_v46, %v1216_v36  ;;  %v1304_v48 = vpop.f32.mrb[18].mxu1 }
 0x470   : > { %v1305_v49 = vpop.f32.mrb[19].mxu1 }
 0x471   : > { %1112 = vst [vmem:[%s429_s26 + $0x10] sm:$0xff] %v1102_v47  ;;  %v1306_v50 = vadd.f32 %v1305_v49, %v1304_v48 }
 0x473   : > { %v1107_v51 = vadd.f32 %v1306_v50, %v1216_v36 }
 0x475   : > { %1113 = vst [vmem:[%s429_s26 + $0x18] sm:$0xff] %v1107_v51 }
 0x476 PF: > { %s23_s21 = sadd.s32 1, %s1498_s21  }
 0x477   : > { %p20_p4 = scmp.ge.s32.totalorder %s23_s21, 4  }
 0x479   :  { %22 = sbr.rel (!%p20_p4) target bundleno = 1 (0x1), region = 106 }

</bundles_post_ra>
